<compile_context>
chip_gen: v7x
topology: tpu7x:2x2x1
jax: 0.10.0
libtpu: 0.0.40
codegen_flags: <defaults>
</compile_context>

<pallas_src>
import math

import jax
import jax.numpy as jnp
from jax.experimental import pallas as pl
from jax.experimental.pallas import tpu as pltpu


def _get_pad(size: int, multiple: int):
    new_size = math.ceil(size / multiple) * multiple
    pad = new_size - size
    left = pad // 2
    return left, pad - left


def _round_up(x: int, m: int) -> int:
    return (x + m - 1) // m * m


def _sublane(itemsize: int) -> int:
    # f32 -> 8 sublanes, bf16/f16 -> 16, int8/fp8 -> 32 (packed sublanes).
    return max(8, 32 // max(1, itemsize))


def _vmem_capacity_bytes() -> int:
    try:
        return int(pltpu.get_tpu_info().vmem_capacity_bytes)
    except Exception:
        # Conservative fallback: v7x per-core VMEM (the smallest generation).
        return 64 * 1024 * 1024


def _choose_block(nc: int, per_idx_bytes: int, pipe_budget: int,
                  granule: int) -> int:
    """Largest leading-dim block that keeps the pipelined working set under
    budget. `granule` is the sublane multiple required when the block's
    leading dim is also the tiled sublane dim (2-D lane-dense path); 1 when
    the leading dim is untiled (3-D path)."""
    blk = max(1, min(nc, pipe_budget // max(1, per_idx_bytes)))
    if blk >= nc:
        # Whole tensor fits one step: split in two so both v7x TensorCores
        # get a "parallel" grid iteration (harmless on v5e/v6e), as long as
        # the sublane-granule constraint still holds.
        if nc >= 2 * granule:
            blk = min(nc, _round_up(pl.cdiv(nc, 2), granule))
    elif granule > 1:
        blk = min(nc, max(granule, (blk // granule) * granule))
    return blk


def center_padding(x: jax.Array, multiple: int) -> jax.Array:
    """Pallas implementation of CenterPadding.forward for 4-D NCHW input."""
    # TODO(synk): the original module pads every dim after the first two for
    # arbitrary rank; this implementation covers the common 4-D NCHW case.
    N, C, H, W = x.shape
    ph_l, ph_r = _get_pad(H, multiple)
    pw_l, pw_r = _get_pad(W, multiple)

    if ph_l == ph_r == pw_l == pw_r == 0:
        # Nothing to pad: skip the kernel (no extra HBM round-trip).
        return x

    Hp = H + ph_l + ph_r
    Wp = W + pw_l + pw_r
    NC = N * C
    itemsize = jnp.dtype(x.dtype).itemsize
    sub = _sublane(itemsize)

    # Generation-aware VMEM budgeting: request an explicit scoped-VMEM limit
    # with headroom below physical capacity, and size the double-buffered
    # (in + out) pipeline plus the pad intermediate well under it.
    cap = _vmem_capacity_bytes()
    vmem_limit = min(int(cap * 0.75), 96 * 1024 * 1024)
    pipe_budget = min(int(vmem_limit * 0.65), 32 * 1024 * 1024)

    bytes_accessed = NC * (H * W + Hp * Wp) * itemsize
    cost = pl.CostEstimate(flops=0, transcendentals=0,
                           bytes_accessed=bytes_accessed)

    # ---------------- Lane-dense fast path: H-only padding ----------------
    if pw_l == 0 and pw_r == 0:
        HW, HpW = H * W, Hp * W
        # Tiled per-leading-index footprint (lane dim is HW / HpW, no lane
        # padding waste when W << 128), x2 for double buffering, plus one
        # output-sized concat intermediate.
        in_b = _round_up(HW, 128) * itemsize
        out_b = _round_up(HpW, 128) * itemsize
        per_idx = 2 * (in_b + out_b) + out_b

        # Only viable if a sublane-granule block fits the budget (it always
        # does for realistic feature maps); otherwise fall through to the
        # general 3-D path below, which also handles H-only padding.
        if min(NC, sub) * per_idx <= pipe_budget:
            blk = _choose_block(NC, per_idx, pipe_budget, granule=sub)
            vmem_limit_ld = min(cap, max(vmem_limit,
                                         blk * per_idx + (4 << 20)))

            def kernel(x_ref, o_ref):
                xv = x_ref[...]                              # (blk, H*W)
                parts = []
                if ph_l:
                    parts.append(jnp.zeros((blk, ph_l * W), xv.dtype))
                parts.append(xv)
                if ph_r:
                    parts.append(jnp.zeros((blk, ph_r * W), xv.dtype))
                # One wide, lane-aligned full-tile store.
                o_ref[...] = (jnp.concatenate(parts, axis=-1)
                              if len(parts) > 1 else xv)

            out = pl.pallas_call(
                kernel,
                out_shape=jax.ShapeDtypeStruct((NC, HpW), x.dtype),
                grid=(pl.cdiv(NC, blk),),
                in_specs=[pl.BlockSpec((blk, HW), lambda i: (i, 0))],
                out_specs=pl.BlockSpec((blk, HpW), lambda i: (i, 0)),
                compiler_params=pltpu.CompilerParams(
                    dimension_semantics=("parallel",),
                    vmem_limit_bytes=int(vmem_limit_ld)),
                cost_estimate=cost,
            )(x.reshape(NC, HW))
            return out.reshape(N, C, Hp, W)

    # ---------------- General path: W (and possibly H) padding ------------
    # Tiled per-leading-index footprint: in block (H, W), out block (Hp, Wp),
    # plus the W-padded middle-band intermediate (H, Wp); x2 on in/out for
    # Pallas double buffering.
    in_b = _round_up(H, sub) * _round_up(W, 128) * itemsize
    out_b = _round_up(Hp, sub) * _round_up(Wp, 128) * itemsize
    tmp_b = _round_up(H, sub) * _round_up(Wp, 128) * itemsize
    per_idx = 2 * (in_b + out_b) + tmp_b
    blk = _choose_block(NC, per_idx, pipe_budget, granule=1)
    vmem_limit_g = min(cap, max(vmem_limit, blk * per_idx + (4 << 20)))

    def kernel(x_ref, o_ref):
        xv = x_ref[...]                                      # (blk, H, W)
        dt = xv.dtype
        # W-pad the middle band only (avoids a full (blk, Hp, Wp) temp).
        parts = []
        if pw_l:
            parts.append(jnp.zeros((blk, H, pw_l), dt))
        parts.append(xv)
        if pw_r:
            parts.append(jnp.zeros((blk, H, pw_r), dt))
        mid = jnp.concatenate(parts, axis=-1) if len(parts) > 1 else xv
        # Zero the H-pad bands directly in the output block.
        if ph_l:
            o_ref[:, :ph_l, :] = jnp.zeros((blk, ph_l, Wp), dt)
        if ph_r:
            o_ref[:, ph_l + H:, :] = jnp.zeros((blk, ph_r, Wp), dt)
        o_ref[:, ph_l:ph_l + H, :] = mid

    out = pl.pallas_call(
        kernel,
        out_shape=jax.ShapeDtypeStruct((NC, Hp, Wp), x.dtype),
        grid=(pl.cdiv(NC, blk),),
        in_specs=[pl.BlockSpec((blk, H, W), lambda i: (i, 0, 0))],
        out_specs=pl.BlockSpec((blk, Hp, Wp), lambda i: (i, 0, 0)),
        compiler_params=pltpu.CompilerParams(
            dimension_semantics=("parallel",),
            vmem_limit_bytes=int(vmem_limit_g)),
        cost_estimate=cost,
    )(x.reshape(NC, H, W))
    return out.reshape(N, C, Hp, Wp)


if __name__ == "__main__":
    multiple = 8

    # Path 1: both H and W padded (13 -> 16): general W-pad kernel.
    x = jax.random.normal(jax.random.PRNGKey(0), (2, 4, 13, 13),
                          dtype=jnp.float32)
    out = jax.block_until_ready(center_padding(x, multiple))
    ph_l, ph_r = _get_pad(x.shape[2], multiple)
    pw_l, pw_r = _get_pad(x.shape[3], multiple)
    ref = jnp.pad(x, ((0, 0), (0, 0), (ph_l, ph_r), (pw_l, pw_r)))
    assert out.shape == ref.shape and out.dtype == ref.dtype
    assert jnp.array_equal(out, ref), "Pallas CenterPadding mismatch (HW pad)"

    # Path 2: H-only padding (W already a multiple): lane-dense kernel.
    x2 = jax.random.normal(jax.random.PRNGKey(1), (2, 4, 13, 16),
                           dtype=jnp.float32)
    out2 = jax.block_until_ready(center_padding(x2, multiple))
    ref2 = jnp.pad(x2, ((0, 0), (0, 0), (1, 2), (0, 0)))
    assert out2.shape == ref2.shape
    assert jnp.array_equal(out2, ref2), "Pallas CenterPadding mismatch (H pad)"

    # Path 3: no padding -> wrapper returns the input unchanged (no kernel).
    x3 = jax.random.normal(jax.random.PRNGKey(2), (1, 4, 16, 16),
                           dtype=jnp.float32)
    out3 = jax.block_until_ready(center_padding(x3, multiple))
    assert out3.shape == x3.shape
    assert jnp.array_equal(out3, x3)

    print("KERNEL_OK")
</pallas_src>

<mosaic_0001>
module attributes {stable_mosaic.version = 11 : i64} {
  func.func @kernel(%arg0: i32, %arg1: memref<4x13x13xf32, #tpu.memory_space<vmem>>, %arg2: memref<4x16x16xf32, #tpu.memory_space<vmem>>) attributes {dimension_semantics = [#tpu.dimension_semantics<parallel>], iteration_bounds = array<i64: 2>, scalar_prefetch = 0 : i64, scratch_operands = 0 : i64, tpu.core_type = #tpu.core_type<tc>, window_params = [{transform_indices = @transform_0, window_bounds = array<i64: 4, 13, 13>}, {transform_indices = @transform_1, window_bounds = array<i64: 4, 16, 16>}]} {
    %c0 = arith.constant 0 : index
    %c0_0 = arith.constant 0 : index
    %c0_1 = arith.constant 0 : index
    %0 = vector.load %arg1[%c0, %c0_0, %c0_1] : memref<4x13x13xf32, #tpu.memory_space<vmem>>, vector<4x13x13xf32>
    %cst = arith.constant 0.000000e+00 : f32
    %1 = vector.broadcast %cst : f32 to vector<4x13x1xf32>
    %cst_2 = arith.constant 0.000000e+00 : f32
    %2 = vector.broadcast %cst_2 : f32 to vector<4x13x2xf32>
    %3 = tpu.concatenate %1, %0, %2 in 2 : vector<4x13x1xf32>, vector<4x13x13xf32>, vector<4x13x2xf32> -> vector<4x13x16xf32>
    %cst_3 = arith.constant 0.000000e+00 : f32
    %4 = vector.broadcast %cst_3 : f32 to vector<4x1x16xf32>
    %c0_4 = arith.constant 0 : index
    %c0_5 = arith.constant 0 : index
    %c0_6 = arith.constant 0 : index
    %5 = vector.load %arg2[%c0_4, %c0_5, %c0_6] : memref<4x16x16xf32, #tpu.memory_space<vmem>>, vector<4x1x16xf32>
    tpu.vector_store %arg2[%c0_4, %c0_5, %c0_6], %4 {strides = array<i32>} : memref<4x16x16xf32, #tpu.memory_space<vmem>>, vector<4x1x16xf32>,
    %cst_7 = arith.constant 0.000000e+00 : f32
    %6 = vector.broadcast %cst_7 : f32 to vector<4x2x16xf32>
    %c0_8 = arith.constant 0 : index
    %c14 = arith.constant 14 : index
    %c0_9 = arith.constant 0 : index
    %7 = vector.load %arg2[%c0_8, %c14, %c0_9] : memref<4x16x16xf32, #tpu.memory_space<vmem>>, vector<4x2x16xf32>
    tpu.vector_store %arg2[%c0_8, %c14, %c0_9], %6 {strides = array<i32>} : memref<4x16x16xf32, #tpu.memory_space<vmem>>, vector<4x2x16xf32>,
    %c0_10 = arith.constant 0 : index
    %c1 = arith.constant 1 : index
    %c0_11 = arith.constant 0 : index
    %8 = vector.load %arg2[%c0_10, %c1, %c0_11] : memref<4x16x16xf32, #tpu.memory_space<vmem>>, vector<4x13x16xf32>
    tpu.vector_store %arg2[%c0_10, %c1, %c0_11], %3 {strides = array<i32>} : memref<4x16x16xf32, #tpu.memory_space<vmem>>, vector<4x13x16xf32>,
    return
  }
  func.func @transform_0(%arg0: i32) -> (i32, i32, i32) {
    %c0_i32 = arith.constant 0 : i32
    %c0_i32_0 = arith.constant 0 : i32
    %c0_i32_1 = arith.constant 0 : i32
    return %arg0, %c0_i32, %c0_i32_0 : i32, i32, i32
  }
  func.func @transform_1(%arg0: i32) -> (i32, i32, i32) {
    %c0_i32 = arith.constant 0 : i32
    %c0_i32_0 = arith.constant 0 : i32
    %c0_i32_1 = arith.constant 0 : i32
    return %arg0, %c0_i32, %c0_i32_0 : i32, i32, i32
  }
}

</mosaic_0001>

<bundles_post_ra>
// kernel: tpu_custom_call.1
= control target key start
LH: loop header
LB: loop body
LE: loop exit
PB: predicated region body
PF: predicated region fallthrough
CT: control target
= control target key end

     0   :  { %6 = vsyncpa [#allocation3], 0  ;;  %s564_s0 = inlined_call_operand.vmem [shape: f32[8,13,13], index: 0, kind: input, shape index: {}]   ;;  %s565_s1 = inlined_call_operand.hbm [shape: f32[8,16,16], index: 1, kind: output, shape index: {}]  }
   0x1   :  { %8 = vsyncpa [#allocation3 + $0x1], 0  ;;  %s415_s6 = smov 0   ;;  %s417_s7 = smov 0  }
   0x2   :  { %s419_s8 = smov 0   ;;  %s421_s9 = smov 0  }
   0x3 LB: > { %s436_s10 = sadd.s32 4294967295, %s398_s9   ;;  %s276_s11 = sadd.s32 4294967294, %s398_s9   ;;  %s398_s9 = sphi %s421_s9, %s571_s9   ;;  %s394_s8 = sphi %s419_s8, %s570_s8   ;;  %s390_s7 = sphi %s417_s7, %s569_s7   ;;  %s386_s6 = sphi %s415_s6, %s568_s6  }
   0x4   : > { %s440_s12 = sadd.s32 1, %s398_s9   ;;  %s47_s13 = sadd.s32 1, %s394_s8 }
   0x5   : > { %s44_s14 = ssub.s32 %s398_s9, %s440_s12  ;;  %p57_p0 = scmp.ne.s32.totalorder %s394_s8, %s390_s7 }
   0x6   : > { %p45_p1 = scmp.eq.s32.totalorder %s44_s14, 0  ;;  %p58_p2 = scmp.eq.s32.totalorder %s436_s10, 1 }
   0x7   : > { %p63_p3 = scmp.ne.s32.totalorder %s390_s7, %s386_s6  ;;  %p64_p4 = scmp.eq.s32.totalorder %s276_s11, 1 }
   0x8   : > { %s451_s15 = scalar_select %p45_p1, %s394_s8, %s47_s13  }
   0x9   : > { %p453_p5 = por %p58_p2, %p57_p0  ;;  %p457_p6 = por %p64_p4, %p63_p3 }
   0xa   : > { %p279_p7 = scmp.ge.s32.totalorder %s398_s9, 1  ;;  %p92_p8 = scmp.lt.s32.totalorder %s398_s9, 3 }
   0xc   : > { %p93_p9 = pnand %p279_p7, %p92_p8 }
   0xd   : > { %s281_s18 = sshll.u32 (!%p93_p9), %s436_s10, 2  ;;  %s110_s19 = sand.u32 (!%p93_p9), 1, %s390_s7   ;;  %vm179_vm0 = vcmask (!%p93_p9), 122880   ;;  %v401_v4 = vmov (!%p93_p9), 0.0   ;;  %vm184_vm1 = vcmask (!%p93_p9), 123904   ;;  %vm161_vm2 = vcmask (!%p93_p9), 7168  }
   0xe   : > { %96 = sbr.rel (%p93_p9) target bundleno = 170 (0xaa), region = 24  ;;  %p114_p10 = scmp.lt.s32.totalorder (!%p93_p9), %s281_s18, 7  ;;  %vm170_vm3 = vcmask (!%p93_p9), 113664   ;;  %vm189_vm4 = vcmask (!%p93_p9), 130048   ;;  %vm191_vm5 = vcmask (!%p93_p9), 126976  }
   0xf   : > { %s280_s21 = sshll.u32 (!%p93_p9), %s110_s19, 6  ;;  %s400_s25 = smov (!%p93_p9), 1  }
  0x10   : > { %s470_s26 = scalar_lea.vmem (!%p93_p9), [#allocation2], %s280_s21  ;;  %s292_s27 = sshll.u32 (!%p93_p9), %s436_s10, 10 }
  0x11   : > { %180 = vst.msk [vmem:[%s470_s26] sm:$0x1] (!%p93_p9), %vm179_vm0, %v401_v4  ;;  %181 = vst.msk [vmem:[%s470_s26 + $0x10] sm:$0x1] (!%p93_p9), %vm179_vm0, %v401_v4  ;;  %s214_s28 = sshll.u32 (!%p93_p9), %s470_s26, 4  ;;  %s509_s2 = scalar_lea.hbm (!%p93_p9), %s565_s1, %s292_s27  ;;  %s511_s28 = int_to_ptr.vmem [resolvable:$true] %s214_s28 }
  0x12   : > { %182 = vst.msk [vmem:[%s470_s26 + $0x20] sm:$0x1] (!%p93_p9), %vm179_vm0, %v401_v4  ;;  %183 = vst.msk [vmem:[%s470_s26 + $0x30] sm:$0x1] (!%p93_p9), %vm179_vm0, %v401_v4  ;;  %s523_s3 = scalar_lea.sflag (!%p93_p9), [#allocation3], %s110_s19  ;;  %s336_s4 = scalar_lea.vmem (!%p93_p9), %s511_s28, 1024 }
  0x13   : > { %185 = vst.msk [vmem:[%s470_s26 + $0xe] sm:$0x3] (!%p93_p9), %vm184_vm1, %v401_v4  ;;  %186 = vst.msk [vmem:[%s470_s26 + $0x1e] sm:$0x3] (!%p93_p9), %vm184_vm1, %v401_v4  ;;  %p337_p11 = scmp.ne.s32.totalorder (!%p93_p9), %s511_s28, %s336_s4  ;;  %s402_s5 = smov (!%p93_p9), [#allocation2]  }
  0x14   : > { %187 = vst.msk [vmem:[%s470_s26 + $0x2e] sm:$0x3] (!%p93_p9), %vm184_vm1, %v401_v4  ;;  %188 = vst.msk [vmem:[%s470_s26 + $0x3e] sm:$0x3] (!%p93_p9), %vm184_vm1, %v401_v4  ;;  %s340_s10 = sshll.u32 (!%p93_p9), %s402_s5, 4  ;;  %s341_s10 = int_to_ptr.vmem [resolvable:$false] %s340_s10 }
  0x15   : > { %s573_s18 = smov (!%p114_p10, %s281_s18), 7  ;;  %p338_p12 = pnand %p337_p11, %p453_p5 }
  0x16   : > { %s290_s20 = sshll.u32 %s573_s18, 4  ;;  %s342_s11 = scalar_lea.vmem %s341_s10, 2048 }
  0x17   : > { %s118_s24 = scalar_lea.vmem %s564_s0, %s290_s20  ;;  %p339_p13 = pneg %p338_p12 }
  0x18   : > { %v123_v0 = vld [vmem:[%s118_s24 + $0x10] sm:$0xff]  ;;  %v121_v1 = vld [vmem:[%s118_s24] sm:$0xff]  ;;  %v124_v2 = vld [vmem:[%s118_s24 + $0x18] sm:$0x1f]  ;;  %p343_p0 = scmp.lt.s32.totalorder %s511_s28, %s341_s10  ;;  %p344_p1 = scmp.lt.s32.totalorder %s342_s11, %s336_s4 }
  0x19   : > { %141 = vrot.lane.b32.xlu1 %v123_v0, %s400_s25  ;;  %137 = vrot.lane.b32.xlu0 %v121_v1, %s400_s25  ;;  %v122_v3 = vld [vmem:[%s118_s24 + $0x8] sm:$0x1f]  ;;  %v125_v6 = vld [vmem:[%s118_s24 + $0x20] sm:$0xff] }
  0x1a   : > { %v126_v5 = vld [vmem:[%s118_s24 + $0x28] sm:$0x1f]  ;;  %v128_v7 = vld [vmem:[%s118_s24 + $0x38] sm:$0x1f]  ;;  %v127_v8 = vld [vmem:[%s118_s24 + $0x30] sm:$0xff]  ;;  %p345_p2 = por %p344_p1, %p343_p0 }
  0x1c   : > { %p346_p3 = pnand %p345_p2, %p339_p13 }
  0x1d   : > { %143 = vrot.lane.b32.xlu1 %v124_v2, %s400_s25  ;;  %139 = vrot.lane.b32.xlu0 %v122_v3, %s400_s25 }
  0x21   : > { %147 = vrot.lane.b32.xlu1 %v126_v5, %s400_s25  ;;  %145 = vrot.lane.b32.xlu0 %v125_v6, %s400_s25 }
  0x25   : > { %151 = vrot.lane.b32.xlu1 %v128_v7, %s400_s25  ;;  %149 = vrot.lane.b32.xlu0 %v127_v8, %s400_s25 }
  0x8b   : > { %v142_v9 = vpop.permute.xlu1 %141  ;;  %v138_v10 = vpop.permute.xlu0 %137 }
  0x8c   : > { %v164_v11 = vsel %vm161_vm2, 0.0, %v142_v9  ;;  %v162_v12 = vsel %vm161_vm2, 0.0, %v138_v10 }
  0x8d   : > { %v173_v13 = vsel %vm170_vm3, %v164_v11, 0.0  ;;  %v171_v14 = vsel %vm170_vm3, %v162_v12, 0.0 }
  0x8e   : > { %193 = vst.msk [vmem:[%s470_s26 + $0x11] sm:$0xff] %vm189_vm4, %v173_v13  ;;  %190 = vst.msk [vmem:[%s470_s26 + $0x1] sm:$0xff] %vm189_vm4, %v171_v14 }
  0x8f   : > { %v144_v15 = vpop.permute.xlu1 %143  ;;  %v140_v16 = vpop.permute.xlu0 %139 }
  0x90   : > { %v165_v17 = vsel %vm161_vm2, 0.0, %v144_v15  ;;  %v163_v18 = vsel %vm161_vm2, 0.0, %v140_v16 }
  0x91   : > { %v174_v19 = vsel %vm170_vm3, %v165_v17, 0.0  ;;  %v172_v20 = vsel %vm170_vm3, %v163_v18, 0.0 }
  0x92   : > { %194 = vst.msk [vmem:[%s470_s26 + $0x19] sm:$0x1f] %vm191_vm5, %v174_v19  ;;  %192 = vst.msk [vmem:[%s470_s26 + $0x9] sm:$0x1f] %vm191_vm5, %v172_v20 }
  0x93   : > { %v148_v21 = vpop.permute.xlu1 %147  ;;  %v146_v22 = vpop.permute.xlu0 %145 }
  0x94   : > { %v167_v23 = vsel %vm161_vm2, 0.0, %v148_v21  ;;  %v166_v24 = vsel %vm161_vm2, 0.0, %v146_v22 }
  0x95   : > { %v176_v25 = vsel %vm170_vm3, %v167_v23, 0.0  ;;  %v175_v26 = vsel %vm170_vm3, %v166_v24, 0.0 }
  0x96   : > { %196 = vst.msk [vmem:[%s470_s26 + $0x29] sm:$0x1f] %vm191_vm5, %v176_v25 }
  0x97   : > { %195 = vst.msk [vmem:[%s470_s26 + $0x21] sm:$0xff] %vm189_vm4, %v175_v26  ;;  %v152_v27 = vpop.permute.xlu1 %151  ;;  %v150_v28 = vpop.permute.xlu0 %149 }
  0x98   : > { %v169_v29 = vsel %vm161_vm2, 0.0, %v152_v27  ;;  %v168_v30 = vsel %vm161_vm2, 0.0, %v150_v28 }
  0x99   : > { %v178_v31 = vsel %vm170_vm3, %v169_v29, 0.0  ;;  %v177_v32 = vsel %vm170_vm3, %v168_v30, 0.0 }
  0x9a   : > { %198 = vst.msk [vmem:[%s470_s26 + $0x39] sm:$0x1f] %vm191_vm5, %v178_v31 }
  0x9b   : > { %197 = vst.msk [vmem:[%s470_s26 + $0x31] sm:$0xff] %vm189_vm4, %v177_v32 }
  0x9c   : > { %349 = shalt.err (!%p346_p3)
}
  0x9d   : > { %s350_s13 = scalar_lea.hbm %s509_s2, 1024  ;;  %s354_s19 = scalar_lea.hbm %s565_s1, 2048 }
  0x9e   : > { %p351_p4 = scmp.ne.s32.totalorder %s509_s2, %s350_s13  ;;  %p355_p9 = scmp.lt.u32.totalorder %s509_s2, %s565_s1 }
  0x9f   : > { %p356_p10 = scmp.lt.u32.totalorder %s354_s19, %s350_s13  ;;  %p358_p12 = scmp.lt.u32.totalorder %s350_s13, %s509_s2 }
  0xa0   : > { %p352_p7 = pnand %p351_p4, %p453_p5 }
  0xa1   : > { %p357_p11 = por %p356_p10, %p355_p9 }
  0xa2   : > { %p353_p8 = pneg %p352_p7 }
  0xa3   : > { %p359_p13 = por %p358_p12, %p357_p11 }
  0xa5   : > { %p360_p0 = pnand %p359_p13, %p353_p8 }
  0xa7   : > { %363 = shalt.err (!%p360_p0)
}
  0xa8   : > { %s403_s22 = smov 128   ;;  %s404_s23 = smov 8  }
  0xa9   : > { %293 = dma.vmem_to_hbm [thread:$0]  (%p453_p5), %s511_s28, 1024, %s509_s2, %s523_s3, %s403_s22, %s403_s22, %s404_s23  }
  0xaa PF: > { %p299_p1 = scmp.ge.s32.totalorder %s398_s9, 2  ;;  %s229_s24 = sand.u32 1, %s386_s6  }
  0xab   : > { %s230_s25 = scalar_lea.sflag [#allocation3], %s229_s24 }
  0xac   : > { %p296_p2 = pnand %p299_p1, %p457_p6 }
  0xae   : > { %381 = dma.done.wait (!%p296_p2), %s230_s25, 1024  }
  0xaf   : > { %383 = vsyncadd (!%p296_p2), %s230_s25, 4294966272  ;;  %p11_p3 = scmp.ge.s32.totalorder %s440_s12, 4   ;;  %s568_s6 = smov %s390_s7 }
  0xb0   : > { %s569_s7 = smov %s394_s8  ;;  %s570_s8 = smov %s451_s15 }
  0xb1   : > { %s571_s9 = smov %s440_s12  ;;  %13 = sbr.rel (!%p11_p3) target bundleno = 3 (0x3), region = 59 }
  0xb8   :  { %235 = vsyncpa [#allocation3], 1 }
  0xb9   :  { %237 = vsyncpa [#allocation3 + $0x1], 1 }

</bundles_post_ra>
